<compile_context>
chip_gen: v7x
topology: tpu7x:2x2x1
jax: 0.10.0
libtpu: 0.0.40
codegen_flags: <defaults>
</compile_context>

<pallas_src>
import jax
import jax.numpy as jnp
from jax.experimental import pallas as pl
from jax.experimental.pallas import tpu as pltpu


_LANE = 128
_VMEM_TILE_BUDGET = 40 << 20   # per-TC block-footprint budget; safe on v7x (64 MiB)


def _round_up(a: int, b: int) -> int:
    return (a + b - 1) // b * b


def _choose_tile(dim: int, cap: int, align: int, candidates) -> tuple[int, int]:
    """Pick (tile, padded_dim) for an axis of (already align-padded) size `dim`.

    Prefers tiles that divide `dim` exactly (no extra padding / wasted MXU
    work); otherwise picks the candidate minimizing padding, preferring the
    larger tile on ties.
    """
    if dim <= cap:
        return dim, dim
    for cand in candidates:                       # largest exact divisor first
        if cand <= cap and cand % align == 0 and dim % cand == 0:
            return cand, dim
    best = None
    for cand in candidates:                       # ragged: minimize padding
        if cand > cap or cand % align:
            continue
        padded = _round_up(dim, cand)
        if best is None or padded < best[1] or (padded == best[1] and cand > best[0]):
            best = (cand, padded)
    if best is None:
        best = (align, dim)
    return best


def _footprint_kres(tm: int, kp: int, tn: int, itemsize: int) -> int:
    # double-buffered x & W tiles + double-buffered output + bias (8-sublane padded)
    return (2 * (tm * kp + kp * tn) * itemsize
            + 2 * tm * tn * itemsize
            + 2 * 8 * tn * itemsize)


def _footprint_kloop(tm: int, tk: int, tn: int, itemsize: int) -> int:
    return (2 * (tm * tk + tk * tn) * itemsize
            + 2 * tm * tn * itemsize
            + 2 * 8 * tn * itemsize
            + tm * tn * 4)                        # f32 accumulator scratch


def _conv1d_kernel_kres(x_ref, w_ref, b_ref, o_ref):
    """Whole K resident in VMEM: one MXU dot + bias add, no accumulator."""
    acc = jnp.dot(x_ref[...], w_ref[...], preferred_element_type=jnp.float32)
    o_ref[...] = (acc + b_ref[...].astype(jnp.float32)).astype(o_ref.dtype)


def _conv1d_kernel_kloop(x_ref, w_ref, b_ref, o_ref, acc_ref):
    """K tiled across grid axis 2: f32 VMEM accumulator, finalize on last k."""
    k = pl.program_id(2)

    @pl.when(k == 0)
    def _init():
        acc_ref[...] = jnp.zeros_like(acc_ref)

    acc_ref[...] += jnp.dot(
        x_ref[...], w_ref[...], preferred_element_type=jnp.float32
    )

    @pl.when(k == pl.num_programs(2) - 1)
    def _finalize():
        o_ref[...] = (
            acc_ref[...] + b_ref[...].astype(jnp.float32)
        ).astype(o_ref.dtype)


def conv1d(x, weight, bias, *, tm=None, tn=None, tk=None):
    """y = x @ weight + bias over the last axis.

    x: (..., nx), weight: (nx, nf), bias: (nf,) -> (..., nf)
    Passing `tk` forces the K-loop (accumulator) path.
    """
    *lead, nx = x.shape
    nf = weight.shape[1]
    x2d = x.reshape(-1, nx)
    M = x2d.shape[0]
    dtype = x.dtype
    itemsize = jnp.dtype(dtype).itemsize
    sub = 8 if itemsize >= 4 else 16              # f32 sublanes / packed bf16

    # Hardware-granularity padding only; tile-driven padding decided below.
    Mp = _round_up(M, sub)
    Kp = _round_up(nx, _LANE)
    Np = _round_up(nf, _LANE)

    # --- tile selection (512x512 default output tiles) -----------------------
    if tm is None:
        tm, Mp = _choose_tile(Mp, cap=512, align=sub,
                              candidates=(512, 448, 384, 320, 256, 192, 128))
    else:
        tm = _round_up(tm, sub)
        Mp = _round_up(Mp, tm)
    if tn is None:
        tn, Np = _choose_tile(Np, cap=512, align=_LANE,
                              candidates=(512, 384, 256, 128))
    else:
        tn = _round_up(tn, _LANE)
        Np = _round_up(Np, tn)

    use_kloop = (tk is not None) or (
        _footprint_kres(tm, Kp, tn, itemsize) > _VMEM_TILE_BUDGET)
    if use_kloop:
        if tk is None:
            tk, Kp = _choose_tile(Kp, cap=512, align=_LANE,
                                  candidates=(512, 384, 256, 128))
        else:
            tk = _round_up(tk, _LANE)
            Kp = _round_up(Kp, tk)
    else:
        tk = Kp

    # --- padding (zero-pad K is exact; padded M rows / N cols sliced off) ----
    if (Mp, Kp) != (M, nx):
        x2d = jnp.pad(x2d, ((0, Mp - M), (0, Kp - nx)))
    w_p = weight
    if (Kp, Np) != (nx, nf):
        w_p = jnp.pad(weight, ((0, Kp - nx), (0, Np - nf)))
    b_p = bias.reshape(1, nf)
    if Np != nf:
        b_p = jnp.pad(b_p, ((0, 0), (0, Np - nf)))

    gi, gj = Mp // tm, Np // tn

    # --- advisory cost: x streamed gj times, W streamed gi times -------------
    cost = pl.CostEstimate(
        flops=2 * Mp * Kp * Np,
        transcendentals=0,
        bytes_accessed=int(itemsize * (
            Mp * Kp * gj + Kp * Np * gi + Np * gi + Mp * Np)),
    )

    if not use_kloop:
        footprint = _footprint_kres(tm, Kp, tn, itemsize)
        vmem_bytes = max(min(int(footprint) + (2 << 20), 48 << 20), 4 << 20)
        out = pl.pallas_call(
            _conv1d_kernel_kres,
            out_shape=jax.ShapeDtypeStruct((Mp, Np), dtype),
            grid_spec=pltpu.PrefetchScalarGridSpec(
                num_scalar_prefetch=0,
                grid=(gi, gj),
                in_specs=[
                    pl.BlockSpec((tm, Kp), lambda i, j: (i, 0)),   # x stripe
                    pl.BlockSpec((Kp, tn), lambda i, j: (0, j)),   # W stripe
                    pl.BlockSpec((1, tn), lambda i, j: (0, j)),    # bias row
                ],
                out_specs=pl.BlockSpec((tm, tn), lambda i, j: (i, j)),
            ),
            compiler_params=pltpu.CompilerParams(
                dimension_semantics=("parallel", "parallel"),
                vmem_limit_bytes=vmem_bytes,
            ),
            cost_estimate=cost,
        )(x2d, w_p, b_p)
    else:
        footprint = _footprint_kloop(tm, tk, tn, itemsize)
        vmem_bytes = max(min(int(footprint) + (2 << 20), 48 << 20), 4 << 20)
        out = pl.pallas_call(
            _conv1d_kernel_kloop,
            out_shape=jax.ShapeDtypeStruct((Mp, Np), dtype),
            grid_spec=pltpu.PrefetchScalarGridSpec(
                num_scalar_prefetch=0,
                grid=(gi, gj, Kp // tk),
                in_specs=[
                    pl.BlockSpec((tm, tk), lambda i, j, k: (i, k)),   # x tile
                    pl.BlockSpec((tk, tn), lambda i, j, k: (k, j)),   # W tile
                    pl.BlockSpec((1, tn), lambda i, j, k: (0, j)),    # bias row
                ],
                out_specs=pl.BlockSpec((tm, tn), lambda i, j, k: (i, j)),
                scratch_shapes=[pltpu.VMEM((tm, tn), jnp.float32)],
            ),
            compiler_params=pltpu.CompilerParams(
                dimension_semantics=("parallel", "parallel", "arbitrary"),
                vmem_limit_bytes=vmem_bytes,
            ),
            cost_estimate=cost,
        )(x2d, w_p, b_p)

    if (Mp, Np) != (M, nf):
        out = out[:M, :nf]
    return out.reshape(*lead, nf)


if __name__ == "__main__":
    # Deterministic params mirroring the PyTorch module:
    #   weight ~ Normal(0, 0.02), shape (nx, nf); bias = zeros(nf)
    nx, nf = 32, 64
    batch, seq = 2, 8

    key = jax.random.PRNGKey(0)
    k_w, k_x = jax.random.split(key)

    weight = 0.02 * jax.random.normal(k_w, (nx, nf), dtype=jnp.float32)
    bias = jnp.zeros((nf,), dtype=jnp.float32)
    x = jax.random.normal(k_x, (batch, seq, nx), dtype=jnp.float32)

    y = jax.block_until_ready(conv1d(x, weight, bias))
    y_ref = (x.reshape(-1, nx) @ weight + bias).reshape(batch, seq, nf)
    assert y.shape == (batch, seq, nf), y.shape
    assert jnp.allclose(y, y_ref, atol=1e-5, rtol=1e-5), "mismatch vs reference"

    # Ragged-M case (M = 21 -> padded only to the sublane multiple, not to tm).
    k_x3, _ = jax.random.split(k_w)
    x3 = jax.random.normal(k_x3, (3, 7, nx), dtype=jnp.float32)
    y3 = jax.block_until_ready(conv1d(x3, weight, bias))
    y3_ref = (x3.reshape(-1, nx) @ weight + bias).reshape(3, 7, nf)
    assert jnp.allclose(y3, y3_ref, atol=1e-5, rtol=1e-5), "ragged-M mismatch"

    # GPT-2-ish shape exercising the K-resident fast path with a multi-tile grid.
    nx2, nf2, M2 = 768, 768, 512
    k_w2, k_x2 = jax.random.split(k_x)
    w2 = 0.02 * jax.random.normal(k_w2, (nx2, nf2), dtype=jnp.float32)
    b2 = 0.1 * jnp.arange(nf2, dtype=jnp.float32)
    x2 = jax.random.normal(k_x2, (4, M2 // 4, nx2), dtype=jnp.float32)
    y2 = jax.block_until_ready(conv1d(x2, w2, b2))
    y2_ref = (x2.reshape(-1, nx2) @ w2 + b2).reshape(4, M2 // 4, nf2)
    assert jnp.allclose(y2, y2_ref, atol=1e-4, rtol=1e-4), "K-resident mismatch"

    # Same shape, forcing the K-loop (accumulator) path to keep it covered.
    y2k = jax.block_until_ready(conv1d(x2, w2, b2, tk=256))
    assert jnp.allclose(y2k, y2_ref, atol=1e-4, rtol=1e-4), "K-loop mismatch"

    print("KERNEL_OK")
</pallas_src>

<mosaic_0001>
module attributes {stable_mosaic.version = 11 : i64} {
  func.func @_conv1d_kernel_kres(%arg0: i32, %arg1: i32, %arg2: memref<16x128xf32, #tpu.memory_space<vmem>>, %arg3: memref<128x128xf32, #tpu.memory_space<vmem>>, %arg4: memref<1x128xf32, #tpu.memory_space<vmem>>, %arg5: memref<16x128xf32, #tpu.memory_space<vmem>>) attributes {dimension_semantics = [#tpu.dimension_semantics<parallel>, #tpu.dimension_semantics<parallel>], iteration_bounds = array<i64: 1, 1>, scalar_prefetch = 0 : i64, scratch_operands = 0 : i64, tpu.core_type = #tpu.core_type<tc>, window_params = [{transform_indices = @transform_0, window_bounds = array<i64: 16, 128>}, {transform_indices = @transform_1, window_bounds = array<i64: 128, 128>}, {transform_indices = @transform_2, window_bounds = array<i64: 1, 128>}, {transform_indices = @transform_3, window_bounds = array<i64: 16, 128>}]} {
    %c0 = arith.constant 0 : index
    %c0_0 = arith.constant 0 : index
    %0 = vector.load %arg2[%c0, %c0_0] : memref<16x128xf32, #tpu.memory_space<vmem>>, vector<16x128xf32>
    %c0_1 = arith.constant 0 : index
    %c0_2 = arith.constant 0 : index
    %1 = vector.load %arg3[%c0_1, %c0_2] : memref<128x128xf32, #tpu.memory_space<vmem>>, vector<128x128xf32>
    %cst = arith.constant dense<0.000000e+00> : vector<16x128xf32>
    %2 = tpu.matmul %0, %1, %cst {dimension_numbers = #tpu.dot_dimension_numbers<[1], [0], [0], [1], [0, 0, 1, 1], [], []>} : vector<16x128xf32>, vector<128x128xf32>, vector<16x128xf32> -> vector<16x128xf32>
    %c0_3 = arith.constant 0 : index
    %c0_4 = arith.constant 0 : index
    %3 = vector.load %arg4[%c0_3, %c0_4] : memref<1x128xf32, #tpu.memory_space<vmem>>, vector<1x128xf32>
    %4 = vector.broadcast %3 : vector<1x128xf32> to vector<16x128xf32>
    %5 = arith.addf %2, %4 : vector<16x128xf32>
    %c0_5 = arith.constant 0 : index
    %c0_6 = arith.constant 0 : index
    %6 = vector.load %arg5[%c0_5, %c0_6] : memref<16x128xf32, #tpu.memory_space<vmem>>, vector<16x128xf32>
    tpu.vector_store %arg5[%c0_5, %c0_6], %5 {strides = array<i32>} : memref<16x128xf32, #tpu.memory_space<vmem>>, vector<16x128xf32>,
    return
  }
  func.func @transform_0(%arg0: i32, %arg1: i32) -> (i32, i32) {
    %c0_i32 = arith.constant 0 : i32
    %c0_i32_0 = arith.constant 0 : i32
    return %arg0, %c0_i32 : i32, i32
  }
  func.func @transform_1(%arg0: i32, %arg1: i32) -> (i32, i32) {
    %c0_i32 = arith.constant 0 : i32
    %c0_i32_0 = arith.constant 0 : i32
    return %c0_i32, %arg1 : i32, i32
  }
  func.func @transform_2(%arg0: i32, %arg1: i32) -> (i32, i32) {
    %c0_i32 = arith.constant 0 : i32
    %c0_i32_0 = arith.constant 0 : i32
    return %c0_i32, %arg1 : i32, i32
  }
  func.func @transform_3(%arg0: i32, %arg1: i32) -> (i32, i32) {
    %c0_i32 = arith.constant 0 : i32
    return %arg0, %arg1 : i32, i32
  }
}

</mosaic_0001>

<bundles_post_ra>
// kernel: tpu_custom_call.1
= control target key start
LH: loop header
LB: loop body
LE: loop exit
PB: predicated region body
PF: predicated region fallthrough
CT: control target
= control target key end

     0   :  { %8 = vsyncpa [#allocation3], 0  ;;  %s399_s0 = inlined_call_operand.hbm [shape: f32[16,128], index: 0, kind: input, shape index: {}]   ;;  %s400_s1 = inlined_call_operand.hbm [shape: f32[128,128], index: 1, kind: input, shape index: {}]   ;;  %s401_s2 = inlined_call_operand.vmem [shape: f32[1,128], index: 2, kind: input, shape index: {}]   ;;  %s402_s3 = inlined_call_operand.hbm [shape: f32[16,128], index: 3, kind: output, shape index: {}]  }
   0x1   :  { %9 = vsyncpa [#allocation6], 0 }
   0x2   :  { %10 = vsyncpa [#allocation4], 0  ;;  %s326_s12 = smov [#allocation2]   ;;  %s254_s16 = scalar_lea.hbm %s399_s0, 256 }
   0x3   :  { %s16_s13 = sshll.u32 %s326_s12, 4  ;;  %p255_p0 = scmp.ne.s32.totalorder %s399_s0, %s254_s16  ;;  %s17_s13 = int_to_ptr.vmem [resolvable:$true] %s16_s13 }
   0x4   :  { %p258_p1 = scmp.lt.u32.totalorder %s254_s16, %s399_s0 }
   0x6   :  { %p260_p2 = pnand %p258_p1, %p255_p0 }
   0x8   :  { %263 = shalt.err (!%p260_p2)
}
   0x9   :  { %s264_s21 = scalar_lea.vmem %s17_s13, 256  ;;  %p269_p4 = scmp.lt.s32.totalorder %s17_s13, %s17_s13 }
   0xa   :  { %p265_p3 = scmp.ne.s32.totalorder %s17_s13, %s264_s21  ;;  %p270_p5 = scmp.lt.s32.totalorder %s264_s21, %s264_s21 }
   0xc   :  { %p271_p6 = por %p270_p5, %p269_p4 }
   0xe   :  { %p272_p7 = pnand %p271_p6, %p265_p3 }
  0x10   :  { %275 = shalt.err (!%p272_p7)
}
  0x11   :  { %s327_s22 = smov 128   ;;  %s328_s23 = smov 8  }
  0x12   :  { %22 = dma.hbm_to_vmem [thread:$0]  %s399_s0, 256, %s17_s13, [#allocation3], %s327_s22, %s327_s22, %s328_s23  }
  0x13   :  { %s329_s26 = smov [#allocation5]   ;;  %s276_s30 = scalar_lea.hbm %s400_s1, 2048 }
  0x14   :  { %s28_s27 = sshll.u32 %s329_s26, 4  ;;  %p277_p8 = scmp.ne.s32.totalorder %s400_s1, %s276_s30  ;;  %s29_s27 = int_to_ptr.vmem [resolvable:$true] %s28_s27 }
  0x15   :  { %p280_p9 = scmp.lt.u32.totalorder %s276_s30, %s400_s1 }
  0x17   :  { %p282_p10 = pnand %p280_p9, %p277_p8 }
  0x19   :  { %285 = shalt.err (!%p282_p10)
}
  0x1a   :  { %s286_s8 = scalar_lea.vmem %s29_s27, 2048  ;;  %p291_p12 = scmp.lt.s32.totalorder %s29_s27, %s29_s27 }
  0x1b   :  { %p287_p11 = scmp.ne.s32.totalorder %s29_s27, %s286_s8  ;;  %p292_p13 = scmp.lt.s32.totalorder %s286_s8, %s286_s8 }
  0x1d   :  { %p293_p0 = por %p292_p13, %p291_p12 }
  0x1f   :  { %p294_p1 = pnand %p293_p0, %p287_p11 }
  0x21   :  { %297 = shalt.err (!%p294_p1)
}
  0x22   :  { %34 = dma.hbm_to_vmem [thread:$0]  %s400_s1, 2048, %s29_s27, [#allocation6], %s327_s22, %s327_s22, %s328_s23  }
  0x23   :  { %320 = dma.done.wait [#allocation3], 256  }
  0x24   :  { %321 = vsyncadd [#allocation3], 4294967040 }
  0x25   :  { %322 = dma.done.wait [#allocation6], 2048  }
  0x26   :  { %323 = vsyncadd [#allocation6], 4294965248  ;;  %v45_v0 = vld [vmem:[#allocation5] sm:$0xff]  ;;  %v46_v1 = vld [vmem:[#allocation5 + $0x8] sm:$0xff]  ;;  %s330_s11 = smov [#allocation7]  }
  0x27   :  { %v47_v2 = vld [vmem:[#allocation5 + $0x10] sm:$0xff]  ;;  %v217_v3 = vpack.c.bf16 %v46_v1, %v45_v0  ;;  %v48_v4 = vld [vmem:[#allocation5 + $0x18] sm:$0xff]  ;;  %v49_v6 = vld [vmem:[#allocation5 + $0x20] sm:$0xff]  ;;  %s150_s12 = sshll.u32 %s330_s11, 4  ;;  %s151_s12 = int_to_ptr.vmem [resolvable:$true] %s150_s12 }
  0x28   :  { %v221_v5 = vpack.c.bf16 %v48_v4, %v47_v2  ;;  %v50_v7 = vld [vmem:[#allocation5 + $0x28] sm:$0xff]  ;;  %v43_v9 = vld [vmem:[#allocation2] sm:$0xff]  ;;  %v52_v11 = vld [vmem:[#allocation5 + $0x38] sm:$0xff]  ;;  %s298_s13 = scalar_lea.vmem %s151_s12, 256  ;;  %p303_p3 = scmp.lt.s32.totalorder %s151_s12, %s151_s12 }
  0x29   :  { %218 = vmatprep.subr.bf16.mxu0 %v217_v3  ;;  %v225_v8 = vpack.c.bf16 %v50_v7, %v49_v6  ;;  %v51_v10 = vld [vmem:[#allocation5 + $0x30] sm:$0xff]  ;;  %214 = vmatprep.mubr.f32.mxu0 %v43_v9  ;;  %v53_v13 = vld [vmem:[#allocation5 + $0x40] sm:$0xff]  ;;  %v54_v14 = vld [vmem:[#allocation5 + $0x48] sm:$0xff]  ;;  %p299_p2 = scmp.ne.s32.totalorder %s151_s12, %s298_s13  ;;  %p304_p4 = scmp.lt.s32.totalorder %s298_s13, %s298_s13 }
  0x2a   :  { %220 = vmatpush3.bf16.msra.mxu0 %v217_v3  ;;  %v229_v12 = vpack.c.bf16 %v52_v11, %v51_v10  ;;  %v233_v15 = vpack.c.bf16 %v54_v14, %v53_v13  ;;  %v55_v16 = vld [vmem:[#allocation5 + $0x50] sm:$0xff]  ;;  %v56_v17 = vld [vmem:[#allocation5 + $0x58] sm:$0xff]  ;;  %v57_v19 = vld [vmem:[#allocation5 + $0x60] sm:$0xff] }
  0x2b   :  { %222 = vmatprep.subr.bf16.mxu0 %v221_v5  ;;  %v237_v18 = vpack.c.bf16 %v56_v17, %v55_v16  ;;  %v58_v20 = vld [vmem:[#allocation5 + $0x68] sm:$0xff]  ;;  %v59_v22 = vld [vmem:[#allocation5 + $0x70] sm:$0xff]  ;;  %v60_v23 = vld [vmem:[#allocation5 + $0x78] sm:$0xff]  ;;  %p305_p5 = por %p304_p4, %p303_p3 }
  0x2c   :  { %v241_v21 = vpack.c.bf16 %v58_v20, %v57_v19  ;;  %v245_v24 = vpack.c.bf16 %v60_v23, %v59_v22  ;;  %v44_v25 = vld [vmem:[#allocation2 + $0x8] sm:$0xff]  ;;  %v163_v26 = vld [vmem:[%s401_s2] ss:$0 sm:$0xff] }
  0x2d   :  { %p306_p6 = pnand %p305_p5, %p299_p2 }
  0x2e   :  { %224 = vmatpush3.bf16.msra.mxu0 %v221_v5 }
  0x2f   :  { %226 = vmatprep.subr.bf16.mxu0 %v225_v8 }
  0x32   :  { %228 = vmatpush3.bf16.msra.mxu0 %v225_v8 }
  0x33   :  { %230 = vmatprep.subr.bf16.mxu0 %v229_v12 }
  0x36   :  { %232 = vmatpush3.bf16.msra.mxu0 %v229_v12 }
  0x37   :  { %234 = vmatprep.subr.bf16.mxu0 %v233_v15 }
  0x3a   :  { %236 = vmatpush3.bf16.msra.mxu0 %v233_v15 }
  0x3b   :  { %238 = vmatprep.subr.bf16.mxu0 %v237_v18 }
  0x3e   :  { %240 = vmatpush3.bf16.msra.mxu0 %v237_v18 }
  0x3f   :  { %242 = vmatprep.subr.bf16.mxu0 %v241_v21 }
  0x42   :  { %244 = vmatpush3.bf16.msra.mxu0 %v241_v21 }
  0x43   :  { %246 = vmatprep.subr.bf16.mxu0 %v245_v24 }
  0x46   :  { %248 = vmatpush3.bf16.msra.mxu0 %v245_v24 }
  0x49   :  { %215 = vmatmul.mubr.f32.vlgmr.msra.gmra.mrb[0].mxu0 %v44_v25 }
 0x11c   :  { %v216_v27 = vpop.f32.mrb[0].mxu0 }
 0x11d   :  { %v140_v28 = vadd.f32 %v216_v27, %v163_v26  ;;  %v134_v29 = vpop.f32.mrb[1].mxu0 }
 0x11e   :  { %v135_v30 = vadd.f32 %v163_v26, %v134_v29 }
 0x11f   :  { %144 = vst [vmem:[#allocation7 + $0x8] sm:$0xff] %v140_v28 }
 0x120   :  { %143 = vst [vmem:[#allocation7] sm:$0xff] %v135_v30 }
 0x121   :  { %309 = shalt.err (!%p306_p6)
}
 0x122   :  { %s310_s2 = scalar_lea.hbm %s402_s3, 256 }
 0x123   :  { %p311_p7 = scmp.ne.s32.totalorder %s402_s3, %s310_s2  ;;  %p314_p8 = scmp.lt.u32.totalorder %s310_s2, %s402_s3 }
 0x125   :  { %p316_p9 = pnand %p314_p8, %p311_p7 }
 0x127   :  { %319 = shalt.err (!%p316_p9)
}
 0x128   :  { %156 = dma.vmem_to_hbm [thread:$0]  %s151_s12, 256, %s402_s3, [#allocation4], %s327_s22, %s327_s22, %s328_s23  }
 0x129   :  { %324 = dma.done.wait [#allocation4], 256  }
 0x12a   :  { %325 = vsyncadd [#allocation4], 4294967040 }
 0x12b   :  { %160 = vsyncpa [#allocation3], 1 }
 0x12c   :  { %161 = vsyncpa [#allocation6], 1 }
 0x12d   :  { %162 = vsyncpa [#allocation4], 1 }

</bundles_post_ra>
